<compile_context>
chip_gen: v6e
topology: v6e:2x2x1
jax: 0.10.0
libtpu: 0.0.40
codegen_flags: <defaults>
</compile_context>

<pallas_src>
import functools

import jax
import jax.numpy as jnp
from jax.experimental import pallas as pl
from jax.experimental.pallas import tpu as pltpu


def _round_up(x, m):
    return ((x + m - 1) // m) * m


def _patch_proj_kernel(p_ref, w_ref, b_ref, o_ref):
    # p_ref: (tm, K) patch tile; w_ref: (K, E) resident weight; b_ref: (1, E) f32 bias.
    # K is un-tiled (small: C*ps*ps), so no accumulator / pl.when init needed.
    acc = jnp.dot(p_ref[...], w_ref[...], preferred_element_type=jnp.float32)
    o_ref[...] = (acc + b_ref[...]).astype(o_ref.dtype)


def patch_embed_forward(x, weight, bias, patch_size, compute_dtype=jnp.bfloat16):
    """PatchEmbed forward.

    x: (B, C, H, W) NCHW.  weight: (E, C, ps, ps).  bias: (E,).
    Returns (B, E, H//ps, W//ps), matching nn.Conv2d(kernel=stride=ps).
    compute_dtype: dtype of patches/weights fed to the MXU (default bf16 for the
    bf16-native MXU on v5e/v6e/v7x and to halve the dominant patches DMA);
    accumulation and the bias add stay f32.  Pass None for an exact f32 path.
    """
    B, C, H, W = x.shape
    E = weight.shape[0]
    ps = patch_size
    assert H % ps == 0 and W % ps == 0
    Hp, Wp = H // ps, W // ps
    out_dtype = x.dtype

    # Cast BEFORE the patch materialization so the (M, K) patch matrix in HBM
    # is already in the compute dtype (halves the dominant DMA for bf16).
    if compute_dtype is not None and x.dtype != compute_dtype:
        x_c = x.astype(compute_dtype)
        w_c = weight.astype(compute_dtype)
    else:
        x_c, w_c = x, weight

    # --- glue: extract non-overlapping patches, flatten in (C, kh, kw) order
    # to match Conv2d's weight layout (E, C, kh, kw).
    xp = x_c.reshape(B, C, Hp, ps, Wp, ps)
    xp = jnp.transpose(xp, (0, 2, 4, 1, 3, 5))            # (B, Hp, Wp, C, ps, ps)
    patches = xp.reshape(B * Hp * Wp, C * ps * ps)        # (M, K)
    w_mat = w_c.reshape(E, C * ps * ps).T                 # (K, E)
    b_mat = bias.reshape(1, E).astype(jnp.float32)        # bias add stays f32

    M, K = patches.shape

    # --- M tiling only.  K and E use full-dim blocks (no HBM padding copies).
    # Big tiles amortize per-step overhead; when M allows, split into >=2 tiles
    # so v7x's two TensorCores both get an M-tile ("parallel" axis).
    tm = min(512, _round_up(M, 8))
    if tm == M and M >= 16:
        tm = _round_up((M + 1) // 2, 8)
    M_pad = _round_up(M, tm)
    if M_pad != M:
        patches = jnp.pad(patches, ((0, M_pad - M), (0, 0)))

    grid = (M_pad // tm,)

    in_item = jnp.dtype(patches.dtype).itemsize
    out_item = jnp.dtype(out_dtype).itemsize

    # Actual HBM traffic: patches once, weight once (resident), bias, output once.
    bytes_acc = (M_pad * K * in_item
                 + K * E * in_item
                 + E * 4
                 + M_pad * E * out_item)
    cost = pl.CostEstimate(flops=2 * M_pad * K * E,
                           transcendentals=0,
                           bytes_accessed=bytes_acc)

    # VMEM budget: double-buffered patch/output tiles + resident weight/bias
    # (allow double-buffered allocation for them too).  Clamp <= 48 MiB so a
    # tuning copied to v7x (64 MiB physical VMEM) never OOMs.
    vmem_needed = (2 * tm * K * in_item
                   + 2 * tm * E * out_item
                   + 2 * (K * E * in_item + E * 4))
    vmem_limit = int(min(max(2 * vmem_needed, 16 * 1024 * 1024), 48 * 1024 * 1024))

    out_flat = pl.pallas_call(
        _patch_proj_kernel,
        out_shape=jax.ShapeDtypeStruct((M_pad, E), out_dtype),
        grid_spec=pltpu.PrefetchScalarGridSpec(
            num_scalar_prefetch=0,
            grid=grid,
            in_specs=[
                pl.BlockSpec((tm, K), lambda i: (i, 0)),   # patch tile (streams over M)
                pl.BlockSpec((K, E), lambda i: (0, 0)),    # whole weight, VMEM-resident
                pl.BlockSpec((1, E), lambda i: (0, 0)),    # whole bias, VMEM-resident
            ],
            out_specs=pl.BlockSpec((tm, E), lambda i: (i, 0)),
        ),
        compiler_params=pltpu.CompilerParams(
            dimension_semantics=("parallel",),   # megacore sharding of M-tiles on v7x
            vmem_limit_bytes=vmem_limit,
        ),
        cost_estimate=cost,
    )(patches, w_mat, b_mat)

    # --- glue: strip M padding (no-op when M_pad == M), back to NCHW (B, E, Hp, Wp).
    if M_pad != M:
        out_flat = out_flat[:M]
    out = out_flat.reshape(B, Hp, Wp, E)
    out = jnp.transpose(out, (0, 3, 1, 2))
    return out
    # norm_layer is None by default in the module, so no norm branch.


if __name__ == "__main__":
    # Small shapes consistent with the module: img_size=16, patch_size=4,
    # in_chans=4, embed_dim=32.
    B, C, H, W = 2, 4, 16, 16
    ps, E = 4, 32

    key = jax.random.PRNGKey(0)
    kx, kw, kb = jax.random.split(key, 3)
    x = jax.random.normal(kx, (B, C, H, W), dtype=jnp.float32)
    weight = jax.random.normal(kw, (E, C, ps, ps), dtype=jnp.float32) * 0.02
    bias = jax.random.normal(kb, (E,), dtype=jnp.float32) * 0.02

    # Reference: XLA's strided conv (same semantics as nn.Conv2d).
    ref = jax.lax.conv_general_dilated(
        x, weight, window_strides=(ps, ps), padding="VALID",
        dimension_numbers=("NCHW", "OIHW", "NCHW"),
    ) + bias.reshape(1, E, 1, 1)

    # Exact f32 path.
    fwd_f32 = jax.jit(functools.partial(patch_embed_forward,
                                        patch_size=ps, compute_dtype=None))
    out_f32 = jax.block_until_ready(fwd_f32(x, weight, bias))
    assert out_f32.shape == (B, E, H // ps, W // ps), out_f32.shape
    assert jnp.allclose(out_f32, ref, atol=1e-4, rtol=1e-4), "f32 mismatch vs reference"

    # Default bf16-compute path (looser tolerance: bf16 input rounding, f32 accumulation).
    fwd = jax.jit(functools.partial(patch_embed_forward, patch_size=ps))
    out = jax.block_until_ready(fwd(x, weight, bias))
    assert out.shape == (B, E, H // ps, W // ps), out.shape
    assert jnp.allclose(out, ref, atol=2e-2, rtol=2e-2), "bf16 mismatch vs reference"

    print("KERNEL_OK")
</pallas_src>

<mosaic_0001>
module attributes {stable_mosaic.version = 11 : i64} {
  func.func @_patch_proj_kernel(%arg0: i32, %arg1: memref<16x64xf32, #tpu.memory_space<vmem>>, %arg2: memref<64x32xf32, #tpu.memory_space<vmem>>, %arg3: memref<1x32xf32, #tpu.memory_space<vmem>>, %arg4: memref<16x32xf32, #tpu.memory_space<vmem>>) attributes {dimension_semantics = [#tpu.dimension_semantics<parallel>], iteration_bounds = array<i64: 2>, scalar_prefetch = 0 : i64, scratch_operands = 0 : i64, tpu.core_type = #tpu.core_type<tc>, window_params = [{transform_indices = @transform_0, window_bounds = array<i64: 16, 64>}, {pipeline_mode = #tpu.pipeline_mode<synchronous>, transform_indices = @transform_1, window_bounds = array<i64: 64, 32>}, {pipeline_mode = #tpu.pipeline_mode<synchronous>, transform_indices = @transform_2, window_bounds = array<i64: 1, 32>}, {transform_indices = @transform_3, window_bounds = array<i64: 16, 32>}]} {
    %c0 = arith.constant 0 : index
    %c0_0 = arith.constant 0 : index
    %0 = vector.load %arg1[%c0, %c0_0] : memref<16x64xf32, #tpu.memory_space<vmem>>, vector<16x64xf32>
    %c0_1 = arith.constant 0 : index
    %c0_2 = arith.constant 0 : index
    %1 = vector.load %arg2[%c0_1, %c0_2] : memref<64x32xf32, #tpu.memory_space<vmem>>, vector<64x32xf32>
    %cst = arith.constant dense<0.000000e+00> : vector<16x32xf32>
    %2 = tpu.matmul %0, %1, %cst {dimension_numbers = #tpu.dot_dimension_numbers<[1], [0], [0], [1], [0, 0, 1, 1], [], []>} : vector<16x64xf32>, vector<64x32xf32>, vector<16x32xf32> -> vector<16x32xf32>
    %c0_3 = arith.constant 0 : index
    %c0_4 = arith.constant 0 : index
    %3 = vector.load %arg3[%c0_3, %c0_4] : memref<1x32xf32, #tpu.memory_space<vmem>>, vector<1x32xf32>
    %4 = vector.broadcast %3 : vector<1x32xf32> to vector<16x32xf32>
    %5 = arith.addf %2, %4 : vector<16x32xf32>
    %c0_5 = arith.constant 0 : index
    %c0_6 = arith.constant 0 : index
    %6 = vector.load %arg4[%c0_5, %c0_6] : memref<16x32xf32, #tpu.memory_space<vmem>>, vector<16x32xf32>
    tpu.vector_store %arg4[%c0_5, %c0_6], %5 {strides = array<i32>} : memref<16x32xf32, #tpu.memory_space<vmem>>, vector<16x32xf32>,
    return
  }
  func.func @transform_0(%arg0: i32) -> (i32, i32) {
    %c0_i32 = arith.constant 0 : i32
    %c0_i32_0 = arith.constant 0 : i32
    return %arg0, %c0_i32 : i32, i32
  }
  func.func @transform_1(%arg0: i32) -> (i32, i32) {
    %c0_i32 = arith.constant 0 : i32
    %c0_i32_0 = arith.constant 0 : i32
    %c0_i32_1 = arith.constant 0 : i32
    return %c0_i32, %c0_i32_0 : i32, i32
  }
  func.func @transform_2(%arg0: i32) -> (i32, i32) {
    %c0_i32 = arith.constant 0 : i32
    %c0_i32_0 = arith.constant 0 : i32
    %c0_i32_1 = arith.constant 0 : i32
    return %c0_i32, %c0_i32_0 : i32, i32
  }
  func.func @transform_3(%arg0: i32) -> (i32, i32) {
    %c0_i32 = arith.constant 0 : i32
    %c0_i32_0 = arith.constant 0 : i32
    return %arg0, %c0_i32 : i32, i32
  }
}

</mosaic_0001>

<bundles_post_ra>
// kernel: patch_embed_forward.1
= control target key start
LH: loop header
LB: loop body
LE: loop exit
PB: predicated region body
PF: predicated region fallthrough
CT: control target
= control target key end

     0   :  { %8 = vsyncpa [#allocation3], 0  ;;  %s651_s0 = inlined_call_operand.vmem [shape: f32[32,64], index: 0, kind: input, shape index: {}]   ;;  %s652_s1 = inlined_call_operand.vmem [shape: f32[64,32], index: 1, kind: input, shape index: {}]   ;;  %s653_s2 = inlined_call_operand.vmem [shape: f32[1,32], index: 2, kind: input, shape index: {}]   ;;  %s654_s3 = inlined_call_operand.hbm [shape: f32[32,32], index: 3, kind: output, shape index: {}]  }
   0x1   :  { %10 = vsyncpa [#allocation3 + $0x1], 0  ;;  %s521_s12 = smov 0   ;;  %s523_s13 = smov 0  }
   0x2   :  { %s525_s14 = smov 0   ;;  %s527_s15 = smov 0  }
   0x3 LB: > { %s542_s16 = sadd.s32 4294967295, %s496_s15   ;;  %s350_s17 = sadd.s32 4294967294, %s496_s15   ;;  %s496_s15 = sphi %s527_s15, %s660_s15   ;;  %s492_s14 = sphi %s525_s14, %s659_s14   ;;  %s488_s13 = sphi %s523_s13, %s658_s13   ;;  %s484_s12 = sphi %s521_s12, %s657_s12  }
   0x4   : > { %s546_s18 = sadd.s32 1, %s496_s15   ;;  %s91_s19 = sadd.s32 1, %s492_s14 }
   0x5   : > { %s88_s20 = ssub.s32 %s496_s15, %s546_s18  ;;  %p101_p0 = scmp.ne.s32.totalorder %s492_s14, %s488_s13 }
   0x6   : > { %p89_p1 = scmp.eq.s32.totalorder %s88_s20, 0  ;;  %p102_p2 = scmp.eq.s32.totalorder %s542_s16, 1 }
   0x7   : > { %p107_p3 = scmp.ne.s32.totalorder %s488_s13, %s484_s12  ;;  %p108_p4 = scmp.eq.s32.totalorder %s350_s17, 1 }
   0x8   : > { %s557_s21 = scalar_select %p89_p1, %s492_s14, %s91_s19  }
   0x9   : > { %p559_p5 = por %p102_p2, %p101_p0  ;;  %p563_p6 = por %p108_p4, %p107_p3 }
   0xa   : > { %p353_p7 = scmp.ge.s32.totalorder %s496_s15, 1  ;;  %p141_p8 = scmp.lt.s32.totalorder %s496_s15, 3 }
   0xc   : > { %p142_p9 = pnand %p353_p7, %p141_p8 }
   0xd   : > { %s355_s28 = sshll.u32 (!%p142_p9), %s542_s16, 1  ;;  %s162_s27 = sand.u32 (!%p142_p9), 1, %s488_s13  }
   0xe   : > { %145 = sbr.rel (%p142_p9) target bundleno = 247 (0xf7), region = 32  ;;  %p166_p10 = scmp.lt.s32.totalorder (!%p142_p9), %s355_s28, 3 }
   0xf   : > { %s611_s10 = scalar_lea.sflag (!%p142_p9), [#allocation3], %s162_s27 }
  0x13   : > { %v181_v0 = vld [vmem:[%s652_s1 + $0x38] sm:$0xff]  ;;  %v180_v1 = vld [vmem:[%s652_s1 + $0x30] sm:$0xff]  ;;  %v179_v2 = vld [vmem:[%s652_s1 + $0x28] sm:$0xff]  ;;  %s662_s28 = smov (!%p166_p10, %s355_s28), 3  ;;  %vm189_vm0 = vcmask 523264   ;;  %vm271_vm1 = vcmask 261120  }
  0x14   : > { %376 = vmatprep.subr.mxu0 %v181_v0  ;;  %v178_v3 = vld [vmem:[%s652_s1 + $0x20] sm:$0xff]  ;;  %s356_s6 = sshll.u32 %s662_s28, 3  ;;  %v177_v4 = vld [vmem:[%s652_s1 + $0x18] sm:$0xff]  ;;  %v176_v6 = vld [vmem:[%s652_s1 + $0x10] sm:$0xff]  ;;  %s354_s28 = sshll.u32 %s162_s27, 4 }
  0x15   : > { %377 = vmatpush3.msra.mxu0 %v181_v0  ;;  %s169_s11 = scalar_lea.vmem %s651_s0, %s356_s6  ;;  %v175_v7 = vld [vmem:[%s652_s1 + $0x8] sm:$0xff]  ;;  %v174_v8 = vld [vmem:[%s652_s1] sm:$0xff]  ;;  %s164_s4 = scalar_lea.vmem [#allocation2], %s354_s28 }
  0x16   : > { %378 = vmatprep.subr.mxu0 %v180_v1  ;;  %v172_v5 = vld [vmem:[%s169_s11] sm:$0xff]  ;;  %v173_v9 = vld [vmem:[%s169_s11 + $0x8] sm:$0xff]  ;;  %s288_s5 = sshll.u32 %s164_s4, 4  ;;  %s365_s6 = sshll.u32 %s542_s16, 8  ;;  %s604_s5 = int_to_ptr.vmem [resolvable:$true] %s288_s5 }
  0x17   : > { %379 = vmatpush3.msra.mxu0 %v180_v1  ;;  %392 = vmatprep.mubr.msk.f32.mxu0 %vm189_vm0, %v172_v5  ;;  %v357_v10 = vld [vmem:[%s653_s2] ss:$0 sm:$0xff]  ;;  %s609_s9 = scalar_lea.hbm %s654_s3, %s365_s6  ;;  %s436_s16 = scalar_lea.vmem %s604_s5, 256 }
  0x18   : > { %380 = vmatprep.subr.mxu0 %v179_v2  ;;  %p437_p11 = scmp.ne.s32.totalorder %s604_s5, %s436_s16  ;;  %s498_s11 = smov [#allocation2]  }
  0x19   : > { %381 = vmatpush3.msra.mxu0 %v179_v2  ;;  %s440_s17 = sshll.u32 %s498_s11, 4  ;;  %s441_s17 = int_to_ptr.vmem [resolvable:$false] %s440_s17 }
  0x1a   : > { %382 = vmatprep.subr.mxu0 %v178_v3  ;;  %p438_p12 = pnand %p437_p11, %p559_p5  ;;  %s442_s19 = scalar_lea.vmem %s441_s17, 512 }
  0x1b   : > { %383 = vmatpush3.msra.mxu0 %v178_v3  ;;  %p443_p0 = scmp.lt.s32.totalorder %s604_s5, %s441_s17  ;;  %p444_p1 = scmp.lt.s32.totalorder %s442_s19, %s436_s16 }
  0x1c   : > { %384 = vmatprep.subr.mxu0 %v177_v4  ;;  %p439_p13 = pneg %p438_p12 }
  0x1d   : > { %385 = vmatpush3.msra.mxu0 %v177_v4  ;;  %p445_p2 = por %p444_p1, %p443_p0 }
  0x1e   : > { %386 = vmatprep.subr.mxu0 %v176_v6 }
  0x1f   : > { %387 = vmatpush3.msra.mxu0 %v176_v6  ;;  %p446_p3 = pnand %p445_p2, %p439_p13 }
  0x20   : > { %388 = vmatprep.subr.mxu0 %v175_v7 }
  0x21   : > { %389 = vmatpush3.msra.mxu0 %v175_v7 }
  0x22   : > { %390 = vmatprep.subr.mxu0 %v174_v8 }
  0x23   : > { %391 = vmatpush3.msra.mxu0 %v174_v8 }
  0x24   : > { %393 = vmatmul.mubr.msk.f32.vlgmr.msra.gmra.mxu0 %vm189_vm0, %v173_v9 }
  0xe4   : > { %v394_v11 = vpop.f32.mrf.mxu0 }
  0xe5   : > { %v268_v12 = vadd.f32 %v394_v11, %v357_v10 }
  0xe6   : > { %v262_v13 = vpop.f32.mrf.mxu0 }
  0xe7   : > { %273 = vst.msk [vmem:[%s164_s4 + $0x8] sm:$0xff] %vm271_vm1, %v268_v12  ;;  %v263_v14 = vadd.f32 %v357_v10, %v262_v13 }
  0xe9   : > { %272 = vst.msk [vmem:[%s164_s4] sm:$0xff] %vm271_vm1, %v263_v14 }
  0xea   : > { %449 = shalt.err (!%p446_p3)
}
  0xeb   : > { %s450_s20 = scalar_lea.hbm %s609_s9, 256  ;;  %s454_s26 = scalar_lea.hbm %s654_s3, 512 }
  0xec   : > { %p451_p4 = scmp.ne.s32.totalorder %s609_s9, %s450_s20  ;;  %p455_p9 = scmp.lt.s32.totalorder %s609_s9, %s654_s3 }
  0xed   : > { %p456_p10 = scmp.lt.s32.totalorder %s454_s26, %s450_s20 }
  0xee   : > { %p452_p7 = pnand %p451_p4, %p559_p5 }
  0xef   : > { %p457_p11 = por %p456_p10, %p455_p9 }
  0xf0   : > { %p453_p8 = pneg %p452_p7 }
  0xf2   : > { %p458_p12 = pnand %p457_p11, %p453_p8 }
  0xf4   : > { %461 = shalt.err (!%p458_p12)
}
  0xf5   : > { %s499_s29 = smov 128   ;;  %s500_s30 = smov 8  }
  0xf6   : > { %395 = dma.vmem_to_hbm [thread:$0]  (%p559_p5), %s604_s5, 256, %s609_s9, %s611_s10, %s499_s29, %s499_s29, %s500_s30  }
  0xf7 PF: > { %p401_p13 = scmp.ge.s32.totalorder %s496_s15, 2  ;;  %s303_s4 = sand.u32 1, %s484_s12  }
  0xf8   : > { %s304_s6 = scalar_lea.sflag [#allocation3], %s303_s4 }
  0xf9   : > { %p398_p0 = pnand %p401_p13, %p563_p6 }
  0xfb   : > { %p399_p1 = pneg %p398_p0 }
  0xfd   : > { %479 = dma.done.wait (%p399_p1), %s304_s6, 256  }
  0xfe   : > { %481 = vsyncadd (%p399_p1), %s304_s6, 4294967040  ;;  %p13_p2 = scmp.ge.s32.totalorder %s546_s18, 4   ;;  %s657_s12 = smov %s488_s13 }
  0xff   : > { %s658_s13 = smov %s492_s14  ;;  %s659_s14 = smov %s557_s21 }
 0x100   : > { %s660_s15 = smov %s546_s18  ;;  %15 = sbr.rel (!%p13_p2) target bundleno = 3 (0x3), region = 67 }
 0x105   :  { %309 = vsyncpa [#allocation3], 1 }
 0x106   :  { %311 = vsyncpa [#allocation3 + $0x1], 1 }

</bundles_post_ra>
